<compile_context>
chip_gen: v6e
topology: v6e:2x2x1
jax: 0.10.0
libtpu: 0.0.40
codegen_flags: <defaults>
</compile_context>

<pallas_src>
import functools

import jax
import jax.numpy as jnp
from jax import lax
from jax.experimental import pallas as pl
from jax.experimental.pallas import tpu as pltpu


def _mha_kernel(x_ref, wqkv_ref, bqkv_ref, wp_ref, bp_ref, o_ref, *,
                n_head, head_size, batch, seq):
    d = n_head * head_size
    bt = batch * seq
    scale = head_size ** -0.5

    x = x_ref[...]                                            # (B*T, D)

    # Single fused QKV projection for all heads.
    qkv = jnp.dot(x, wqkv_ref[...],
                  preferred_element_type=jnp.float32) + bqkv_ref[...]  # (B*T, 3D)

    # Finite additive causal-mask bias (NaN-safe under any future T padding).
    row = lax.broadcasted_iota(jnp.int32, (seq, seq), 0)
    col = lax.broadcasted_iota(jnp.int32, (seq, seq), 1)
    mask_bias = jnp.where(col <= row, jnp.float32(0.0), jnp.float32(-1e30))

    wp = wp_ref[...]                                          # (D, D)
    acc = jnp.zeros((bt, d), jnp.float32)

    # Per-head attention (small static loop; all projection FLOPs live in the
    # fused matmuls).  Batched over the batch dim via einsum, no k transpose.
    for h in range(n_head):
        lo = h * head_size
        q = qkv[:, lo:lo + head_size].reshape(batch, seq, head_size) * scale
        k = qkv[:, d + lo:d + lo + head_size].reshape(batch, seq, head_size)
        v = qkv[:, 2 * d + lo:2 * d + lo + head_size].reshape(batch, seq, head_size)

        s = jnp.einsum('bqd,bkd->bqk', q, k,
                       preferred_element_type=jnp.float32)    # (B, T, T)
        s = s + mask_bias                                     # broadcast over B
        s = s - jnp.max(s, axis=-1, keepdims=True)
        p = jnp.exp(s)
        inv = pl.reciprocal(jnp.sum(p, axis=-1, keepdims=True), approx=True)
        p = p * inv
        out_h = jnp.einsum('bqk,bkd->bqd', p, v,
                           preferred_element_type=jnp.float32)  # (B, T, HS)

        # Fold this head straight into the output projection:
        #   cat @ Wp == sum_h out_h @ Wp[h*HS:(h+1)*HS, :]
        acc = acc + jnp.dot(out_h.reshape(bt, head_size),
                            wp[lo:lo + head_size, :],
                            preferred_element_type=jnp.float32)

    o_ref[...] = (acc + bp_ref[...]).astype(o_ref.dtype)


def multi_head_attention(x, wq, wk, wv, bq, bk, bv, wp, bp):
    """x: (B, T, D); wq/wk/wv: (H, D, HS); bq/bk/bv: (H, HS); wp: (D, D); bp: (1, D)."""
    B, T, D = x.shape
    H, _, HS = wq.shape

    # One-time weight prep (outside the kernel): fuse Q/K/V across heads into a
    # single lane-dense (D, 3*D) matmul weight, head-major within each third.
    def flat_w(w):  # (H, D, HS) -> (D, H*HS)
        return jnp.transpose(w, (1, 0, 2)).reshape(D, H * HS)

    wqkv = jnp.concatenate([flat_w(wq), flat_w(wk), flat_w(wv)], axis=1)   # (D, 3D)
    bqkv = jnp.concatenate([bq.reshape(1, H * HS),
                            bk.reshape(1, H * HS),
                            bv.reshape(1, H * HS)], axis=1)                # (1, 3D)

    x2 = x.reshape(B * T, D)   # flatten batch into the matmul M dimension
    kernel = functools.partial(_mha_kernel, n_head=H, head_size=HS,
                               batch=B, seq=T)

    out2 = pl.pallas_call(
        kernel,
        out_shape=jax.ShapeDtypeStruct((B * T, D), x.dtype),
        grid=(1,),   # whole problem in one invocation (no per-batch grid overhead)
        in_specs=[
            pl.BlockSpec((B * T, D), lambda i: (0, 0)),    # x (flattened)
            pl.BlockSpec((D, 3 * D), lambda i: (0, 0)),    # fused QKV weight
            pl.BlockSpec((1, 3 * D), lambda i: (0, 0)),    # fused QKV bias
            pl.BlockSpec((D, D), lambda i: (0, 0)),        # output proj weight
            pl.BlockSpec((1, D), lambda i: (0, 0)),        # output proj bias
        ],
        out_specs=pl.BlockSpec((B * T, D), lambda i: (0, 0)),
        compiler_params=pltpu.CompilerParams(
            dimension_semantics=("arbitrary",)),
    )(x2, wqkv, bqkv, wp, bp)
    return out2.reshape(B, T, D)


def _reference_mha(x, wq, wk, wv, bq, bk, bv, wp, bp):
    """Pure-JAX reference mirroring the PyTorch forward (eval mode)."""
    B, T, D = x.shape
    H, _, HS = wq.shape
    scale = HS ** -0.5
    tril = jnp.tril(jnp.ones((T, T), dtype=bool))
    outs = []
    for h in range(H):
        q = x @ wq[h] + bq[h]
        k = x @ wk[h] + bk[h]
        v = x @ wv[h] + bv[h]
        att = jnp.einsum("btd,bsd->bts", q, k) * scale
        att = jnp.where(tril, att, -jnp.inf)
        att = jax.nn.softmax(att, axis=-1)
        outs.append(jnp.einsum("bts,bsd->btd", att, v))
    cat = jnp.concatenate(outs, axis=-1)
    return cat @ wp + bp[0]


if __name__ == "__main__":
    # Config implied by the module: n_embd=32, n_head=4 -> head_size=8,
    # cw_size (context window) = 8, batch = 2, p_dropout = 0.0 (eval).
    B, T, D, H = 2, 8, 32, 4
    HS = D // H

    key = jax.random.PRNGKey(0)
    ks = jax.random.split(key, 10)
    x  = jax.random.normal(ks[0], (B, T, D), dtype=jnp.float32)
    wq = jax.random.normal(ks[1], (H, D, HS), dtype=jnp.float32) * 0.1
    wk = jax.random.normal(ks[2], (H, D, HS), dtype=jnp.float32) * 0.1
    wv = jax.random.normal(ks[3], (H, D, HS), dtype=jnp.float32) * 0.1
    bq = jax.random.normal(ks[4], (H, HS), dtype=jnp.float32) * 0.1
    bk = jax.random.normal(ks[5], (H, HS), dtype=jnp.float32) * 0.1
    bv = jax.random.normal(ks[6], (H, HS), dtype=jnp.float32) * 0.1
    wp = jax.random.normal(ks[7], (D, D), dtype=jnp.float32) * 0.1
    bp = jax.random.normal(ks[8], (1, D), dtype=jnp.float32) * 0.1

    out = multi_head_attention(x, wq, wk, wv, bq, bk, bv, wp, bp)
    out = jax.block_until_ready(out)

    ref = _reference_mha(x, wq, wk, wv, bq, bk, bv, wp, bp)
    assert out.shape == (B, T, D)
    # Tolerance loosened slightly vs. exact-division softmax because the kernel
    # uses the EUP approximate reciprocal (pl.reciprocal(..., approx=True)).
    assert jnp.allclose(out, ref, atol=2e-3, rtol=2e-3), "mismatch vs reference"
    print("KERNEL_OK")
</pallas_src>

<mosaic_0001>
module attributes {stable_mosaic.version = 11 : i64} {
  func.func @_mha_kernel(%arg0: i32, %arg1: memref<16x32xf32, #tpu.memory_space<vmem>>, %arg2: memref<32x96xf32, #tpu.memory_space<vmem>>, %arg3: memref<1x96xf32, #tpu.memory_space<vmem>>, %arg4: memref<32x32xf32, #tpu.memory_space<vmem>>, %arg5: memref<1x32xf32, #tpu.memory_space<vmem>>, %arg6: memref<16x32xf32, #tpu.memory_space<vmem>>) attributes {dimension_semantics = [#tpu.dimension_semantics<arbitrary>], iteration_bounds = array<i64: 1>, scalar_prefetch = 0 : i64, scratch_operands = 0 : i64, tpu.core_type = #tpu.core_type<tc>, window_params = [{pipeline_mode = #tpu.pipeline_mode<synchronous>, transform_indices = @transform_0, window_bounds = array<i64: 16, 32>}, {pipeline_mode = #tpu.pipeline_mode<synchronous>, transform_indices = @transform_1, window_bounds = array<i64: 32, 96>}, {pipeline_mode = #tpu.pipeline_mode<synchronous>, transform_indices = @transform_2, window_bounds = array<i64: 1, 96>}, {pipeline_mode = #tpu.pipeline_mode<synchronous>, transform_indices = @transform_3, window_bounds = array<i64: 32, 32>}, {pipeline_mode = #tpu.pipeline_mode<synchronous>, transform_indices = @transform_4, window_bounds = array<i64: 1, 32>}, {pipeline_mode = #tpu.pipeline_mode<synchronous>, transform_indices = @transform_5, window_bounds = array<i64: 16, 32>}]} {
    %c0 = arith.constant 0 : index
    %c0_0 = arith.constant 0 : index
    %0 = vector.load %arg1[%c0, %c0_0] : memref<16x32xf32, #tpu.memory_space<vmem>>, vector<16x32xf32>
    %c0_1 = arith.constant 0 : index
    %c0_2 = arith.constant 0 : index
    %1 = vector.load %arg2[%c0_1, %c0_2] : memref<32x96xf32, #tpu.memory_space<vmem>>, vector<32x96xf32>
    %cst = arith.constant dense<0.000000e+00> : vector<16x96xf32>
    %2 = tpu.matmul %0, %1, %cst {dimension_numbers = #tpu.dot_dimension_numbers<[1], [0], [0], [1], [0, 0, 1, 1], [], []>} : vector<16x32xf32>, vector<32x96xf32>, vector<16x96xf32> -> vector<16x96xf32>
    %c0_3 = arith.constant 0 : index
    %c0_4 = arith.constant 0 : index
    %3 = vector.load %arg3[%c0_3, %c0_4] : memref<1x96xf32, #tpu.memory_space<vmem>>, vector<1x96xf32>
    %4 = vector.broadcast %3 : vector<1x96xf32> to vector<16x96xf32>
    %5 = arith.addf %2, %4 : vector<16x96xf32>
    %6 = tpu.iota {dimensions = array<i32: 0>} : vector<8x8xi32>
    %7 = tpu.iota {dimensions = array<i32: 1>} : vector<8x8xi32>
    %8 = arith.cmpi sle, %7, %6 : vector<8x8xi32>
    %cst_5 = arith.constant 0.000000e+00 : f32
    %cst_6 = arith.constant -1.000000e+30 : f32
    %9 = vector.broadcast %cst_5 : f32 to vector<8x8xf32>
    %10 = vector.broadcast %cst_6 : f32 to vector<8x8xf32>
    %11 = arith.select %8, %9, %10 : vector<8x8xi1>, vector<8x8xf32>
    %c0_7 = arith.constant 0 : index
    %c0_8 = arith.constant 0 : index
    %12 = vector.load %arg4[%c0_7, %c0_8] : memref<32x32xf32, #tpu.memory_space<vmem>>, vector<32x32xf32>
    %cst_9 = arith.constant 0.000000e+00 : f32
    %13 = vector.broadcast %cst_9 : f32 to vector<16x32xf32>
    %14 = vector.extract_strided_slice %5 {offsets = [0, 0], sizes = [16, 8], strides = [1, 1]} : vector<16x96xf32> to vector<16x8xf32>
    %15 = vector.shape_cast %14 : vector<16x8xf32> to vector<2x8x8xf32>
    %cst_10 = arith.constant 0.353553385 : f32
    %16 = vector.broadcast %cst_10 : f32 to vector<2x8x8xf32>
    %17 = arith.mulf %15, %16 : vector<2x8x8xf32>
    %18 = vector.extract_strided_slice %5 {offsets = [0, 32], sizes = [16, 8], strides = [1, 1]} : vector<16x96xf32> to vector<16x8xf32>
    %19 = vector.shape_cast %18 : vector<16x8xf32> to vector<2x8x8xf32>
    %20 = vector.extract_strided_slice %5 {offsets = [0, 64], sizes = [16, 8], strides = [1, 1]} : vector<16x96xf32> to vector<16x8xf32>
    %21 = vector.shape_cast %20 : vector<16x8xf32> to vector<2x8x8xf32>
    "tpu.trace_start"() <{level = 10 : i32, message = "bqd,bkd->bqk"}> : () -> ()
    %cst_11 = arith.constant dense<0.000000e+00> : vector<2x8x8xf32>
    %22 = tpu.matmul %17, %19, %cst_11 {dimension_numbers = #tpu.dot_dimension_numbers<[2], [2], [1], [1], [0, 0, 0, 1, 1, 1], [0], [0]>} : vector<2x8x8xf32>, vector<2x8x8xf32>, vector<2x8x8xf32> -> vector<2x8x8xf32>
    "tpu.trace_stop"() : () -> ()
    %23 = vector.shape_cast %11 : vector<8x8xf32> to vector<1x8x8xf32>
    %24 = vector.broadcast %23 : vector<1x8x8xf32> to vector<2x8x8xf32>
    %25 = arith.addf %22, %24 : vector<2x8x8xf32>
    %cst_12 = arith.constant dense<0xFF800000> : vector<2x8xf32>
    %26 = vector.multi_reduction <maximumf>, %25, %cst_12 [2] : vector<2x8x8xf32> to vector<2x8xf32>
    %27 = vector.shape_cast %26 : vector<2x8xf32> to vector<2x8x1xf32>
    %28 = vector.broadcast %27 : vector<2x8x1xf32> to vector<2x8x8xf32>
    %29 = arith.subf %25, %28 : vector<2x8x8xf32>
    %30 = math.exp %29 : vector<2x8x8xf32>
    %cst_13 = arith.constant dense<0.000000e+00> : vector<2x8xf32>
    %31 = vector.multi_reduction <add>, %30, %cst_13 [2] : vector<2x8x8xf32> to vector<2x8xf32>
    %32 = vector.shape_cast %31 : vector<2x8xf32> to vector<2x8x1xf32>
    %33 = tpu.reciprocal %32 {approx = true} : vector<2x8x1xf32> -> vector<2x8x1xf32>
    %34 = vector.broadcast %33 : vector<2x8x1xf32> to vector<2x8x8xf32>
    %35 = arith.mulf %30, %34 : vector<2x8x8xf32>
    "tpu.trace_start"() <{level = 10 : i32, message = "bqk,bkd->bqd"}> : () -> ()
    %cst_14 = arith.constant dense<0.000000e+00> : vector<2x8x8xf32>
    %36 = tpu.matmul %35, %21, %cst_14 {dimension_numbers = #tpu.dot_dimension_numbers<[2], [1], [1], [2], [0, 0, 0, 1, 1, 2], [0], [0]>} : vector<2x8x8xf32>, vector<2x8x8xf32>, vector<2x8x8xf32> -> vector<2x8x8xf32>
    "tpu.trace_stop"() : () -> ()
    %37 = vector.shape_cast %36 : vector<2x8x8xf32> to vector<16x8xf32>
    %38 = vector.extract_strided_slice %12 {offsets = [0, 0], sizes = [8, 32], strides = [1, 1]} : vector<32x32xf32> to vector<8x32xf32>
    %cst_15 = arith.constant dense<0.000000e+00> : vector<16x32xf32>
    %39 = tpu.matmul %37, %38, %cst_15 {dimension_numbers = #tpu.dot_dimension_numbers<[1], [0], [0], [1], [0, 0, 1, 1], [], []>} : vector<16x8xf32>, vector<8x32xf32>, vector<16x32xf32> -> vector<16x32xf32>
    %40 = arith.addf %13, %39 : vector<16x32xf32>
    %41 = vector.extract_strided_slice %5 {offsets = [0, 8], sizes = [16, 8], strides = [1, 1]} : vector<16x96xf32> to vector<16x8xf32>
    %42 = vector.shape_cast %41 : vector<16x8xf32> to vector<2x8x8xf32>
    %cst_16 = arith.constant 0.353553385 : f32
    %43 = vector.broadcast %cst_16 : f32 to vector<2x8x8xf32>
    %44 = arith.mulf %42, %43 : vector<2x8x8xf32>
    %45 = vector.extract_strided_slice %5 {offsets = [0, 40], sizes = [16, 8], strides = [1, 1]} : vector<16x96xf32> to vector<16x8xf32>
    %46 = vector.shape_cast %45 : vector<16x8xf32> to vector<2x8x8xf32>
    %47 = vector.extract_strided_slice %5 {offsets = [0, 72], sizes = [16, 8], strides = [1, 1]} : vector<16x96xf32> to vector<16x8xf32>
    %48 = vector.shape_cast %47 : vector<16x8xf32> to vector<2x8x8xf32>
    "tpu.trace_start"() <{level = 10 : i32, message = "bqd,bkd->bqk"}> : () -> ()
    %cst_17 = arith.constant dense<0.000000e+00> : vector<2x8x8xf32>
    %49 = tpu.matmul %44, %46, %cst_17 {dimension_numbers = #tpu.dot_dimension_numbers<[2], [2], [1], [1], [0, 0, 0, 1, 1, 1], [0], [0]>} : vector<2x8x8xf32>, vector<2x8x8xf32>, vector<2x8x8xf32> -> vector<2x8x8xf32>
    "tpu.trace_stop"() : () -> ()
    %50 = vector.shape_cast %11 : vector<8x8xf32> to vector<1x8x8xf32>
    %51 = vector.broadcast %50 : vector<1x8x8xf32> to vector<2x8x8xf32>
    %52 = arith.addf %49, %51 : vector<2x8x8xf32>
    %cst_18 = arith.constant dense<0xFF800000> : vector<2x8xf32>
    %53 = vector.multi_reduction <maximumf>, %52, %cst_18 [2] : vector<2x8x8xf32> to vector<2x8xf32>
    %54 = vector.shape_cast %53 : vector<2x8xf32> to vector<2x8x1xf32>
    %55 = vector.broadcast %54 : vector<2x8x1xf32> to vector<2x8x8xf32>
    %56 = arith.subf %52, %55 : vector<2x8x8xf32>
    %57 = math.exp %56 : vector<2x8x8xf32>
    %cst_19 = arith.constant dense<0.000000e+00> : vector<2x8xf32>
    %58 = vector.multi_reduction <add>, %57, %cst_19 [2] : vector<2x8x8xf32> to vector<2x8xf32>
    %59 = vector.shape_cast %58 : vector<2x8xf32> to vector<2x8x1xf32>
    %60 = tpu.reciprocal %59 {approx = true} : vector<2x8x1xf32> -> vector<2x8x1xf32>
    %61 = vector.broadcast %60 : vector<2x8x1xf32> to vector<2x8x8xf32>
    %62 = arith.mulf %57, %61 : vector<2x8x8xf32>
    "tpu.trace_start"() <{level = 10 : i32, message = "bqk,bkd->bqd"}> : () -> ()
    %cst_20 = arith.constant dense<0.000000e+00> : vector<2x8x8xf32>
    %63 = tpu.matmul %62, %48, %cst_20 {dimension_numbers = #tpu.dot_dimension_numbers<[2], [1], [1], [2], [0, 0, 0, 1, 1, 2], [0], [0]>} : vector<2x8x8xf32>, vector<2x8x8xf32>, vector<2x8x8xf32> -> vector<2x8x8xf32>
    "tpu.trace_stop"() : () -> ()
    %64 = vector.shape_cast %63 : vector<2x8x8xf32> to vector<16x8xf32>
    %65 = vector.extract_strided_slice %12 {offsets = [8, 0], sizes = [8, 32], strides = [1, 1]} : vector<32x32xf32> to vector<8x32xf32>
    %cst_21 = arith.constant dense<0.000000e+00> : vector<16x32xf32>
    %66 = tpu.matmul %64, %65, %cst_21 {dimension_numbers = #tpu.dot_dimension_numbers<[1], [0], [0], [1], [0, 0, 1, 1], [], []>} : vector<16x8xf32>, vector<8x32xf32>, vector<16x32xf32> -> vector<16x32xf32>
    %67 = arith.addf %40, %66 : vector<16x32xf32>
    %68 = vector.extract_strided_slice %5 {offsets = [0, 16], sizes = [16, 8], strides = [1, 1]} : vector<16x96xf32> to vector<16x8xf32>
    %69 = vector.shape_cast %68 : vector<16x8xf32> to vector<2x8x8xf32>
    %cst_22 = arith.constant 0.353553385 : f32
    %70 = vector.broadcast %cst_22 : f32 to vector<2x8x8xf32>
    %71 = arith.mulf %69, %70 : vector<2x8x8xf32>
    %72 = vector.extract_strided_slice %5 {offsets = [0, 48], sizes = [16, 8], strides = [1, 1]} : vector<16x96xf32> to vector<16x8xf32>
    %73 = vector.shape_cast %72 : vector<16x8xf32> to vector<2x8x8xf32>
    %74 = vector.extract_strided_slice %5 {offsets = [0, 80], sizes = [16, 8], strides = [1, 1]} : vector<16x96xf32> to vector<16x8xf32>
    %75 = vector.shape_cast %74 : vector<16x8xf32> to vector<2x8x8xf32>
    "tpu.trace_start"() <{level = 10 : i32, message = "bqd,bkd->bqk"}> : () -> ()
    %cst_23 = arith.constant dense<0.000000e+00> : vector<2x8x8xf32>
    %76 = tpu.matmul %71, %73, %cst_23 {dimension_numbers = #tpu.dot_dimension_numbers<[2], [2], [1], [1], [0, 0, 0, 1, 1, 1], [0], [0]>} : vector<2x8x8xf32>, vector<2x8x8xf32>, vector<2x8x8xf32> -> vector<2x8x8xf32>
    "tpu.trace_stop"() : () -> ()
    %77 = vector.shape_cast %11 : vector<8x8xf32> to vector<1x8x8xf32>
    %78 = vector.broadcast %77 : vector<1x8x8xf32> to vector<2x8x8xf32>
    %79 = arith.addf %76, %78 : vector<2x8x8xf32>
    %cst_24 = arith.constant dense<0xFF800000> : vector<2x8xf32>
    %80 = vector.multi_reduction <maximumf>, %79, %cst_24 [2] : vector<2x8x8xf32> to vector<2x8xf32>
    %81 = vector.shape_cast %80 : vector<2x8xf32> to vector<2x8x1xf32>
    %82 = vector.broadcast %81 : vector<2x8x1xf32> to vector<2x8x8xf32>
    %83 = arith.subf %79, %82 : vector<2x8x8xf32>
    %84 = math.exp %83 : vector<2x8x8xf32>
    %cst_25 = arith.constant dense<0.000000e+00> : vector<2x8xf32>
    %85 = vector.multi_reduction <add>, %84, %cst_25 [2] : vector<2x8x8xf32> to vector<2x8xf32>
    %86 = vector.shape_cast %85 : vector<2x8xf32> to vector<2x8x1xf32>
    %87 = tpu.reciprocal %86 {approx = true} : vector<2x8x1xf32> -> vector<2x8x1xf32>
    %88 = vector.broadcast %87 : vector<2x8x1xf32> to vector<2x8x8xf32>
    %89 = arith.mulf %84, %88 : vector<2x8x8xf32>
    "tpu.trace_start"() <{level = 10 : i32, message = "bqk,bkd->bqd"}> : () -> ()
    %cst_26 = arith.constant dense<0.000000e+00> : vector<2x8x8xf32>
    %90 = tpu.matmul %89, %75, %cst_26 {dimension_numbers = #tpu.dot_dimension_numbers<[2], [1], [1], [2], [0, 0, 0, 1, 1, 2], [0], [0]>} : vector<2x8x8xf32>, vector<2x8x8xf32>, vector<2x8x8xf32> -> vector<2x8x8xf32>
    "tpu.trace_stop"() : () -> ()
    %91 = vector.shape_cast %90 : vector<2x8x8xf32> to vector<16x8xf32>
    %92 = vector.extract_strided_slice %12 {offsets = [16, 0], sizes = [8, 32], strides = [1, 1]} : vector<32x32xf32> to vector<8x32xf32>
    %cst_27 = arith.constant dense<0.000000e+00> : vector<16x32xf32>
    %93 = tpu.matmul %91, %92, %cst_27 {dimension_numbers = #tpu.dot_dimension_numbers<[1], [0], [0], [1], [0, 0, 1, 1], [], []>} : vector<16x8xf32>, vector<8x32xf32>, vector<16x32xf32> -> vector<16x32xf32>
    %94 = arith.addf %67, %93 : vector<16x32xf32>
    %95 = vector.extract_strided_slice %5 {offsets = [0, 24], sizes = [16, 8], strides = [1, 1]} : vector<16x96xf32> to vector<16x8xf32>
    %96 = vector.shape_cast %95 : vector<16x8xf32> to vector<2x8x8xf32>
    %cst_28 = arith.constant 0.353553385 : f32
    %97 = vector.broadcast %cst_28 : f32 to vector<2x8x8xf32>
    %98 = arith.mulf %96, %97 : vector<2x8x8xf32>
    %99 = vector.extract_strided_slice %5 {offsets = [0, 56], sizes = [16, 8], strides = [1, 1]} : vector<16x96xf32> to vector<16x8xf32>
    %100 = vector.shape_cast %99 : vector<16x8xf32> to vector<2x8x8xf32>
    %101 = vector.extract_strided_slice %5 {offsets = [0, 88], sizes = [16, 8], strides = [1, 1]} : vector<16x96xf32> to vector<16x8xf32>
    %102 = vector.shape_cast %101 : vector<16x8xf32> to vector<2x8x8xf32>
    "tpu.trace_start"() <{level = 10 : i32, message = "bqd,bkd->bqk"}> : () -> ()
    %cst_29 = arith.constant dense<0.000000e+00> : vector<2x8x8xf32>
    %103 = tpu.matmul %98, %100, %cst_29 {dimension_numbers = #tpu.dot_dimension_numbers<[2], [2], [1], [1], [0, 0, 0, 1, 1, 1], [0], [0]>} : vector<2x8x8xf32>, vector<2x8x8xf32>, vector<2x8x8xf32> -> vector<2x8x8xf32>
    "tpu.trace_stop"() : () -> ()
    %104 = vector.shape_cast %11 : vector<8x8xf32> to vector<1x8x8xf32>
    %105 = vector.broadcast %104 : vector<1x8x8xf32> to vector<2x8x8xf32>
    %106 = arith.addf %103, %105 : vector<2x8x8xf32>
    %cst_30 = arith.constant dense<0xFF800000> : vector<2x8xf32>
    %107 = vector.multi_reduction <maximumf>, %106, %cst_30 [2] : vector<2x8x8xf32> to vector<2x8xf32>
    %108 = vector.shape_cast %107 : vector<2x8xf32> to vector<2x8x1xf32>
    %109 = vector.broadcast %108 : vector<2x8x1xf32> to vector<2x8x8xf32>
    %110 = arith.subf %106, %109 : vector<2x8x8xf32>
    %111 = math.exp %110 : vector<2x8x8xf32>
    %cst_31 = arith.constant dense<0.000000e+00> : vector<2x8xf32>
    %112 = vector.multi_reduction <add>, %111, %cst_31 [2] : vector<2x8x8xf32> to vector<2x8xf32>
    %113 = vector.shape_cast %112 : vector<2x8xf32> to vector<2x8x1xf32>
    %114 = tpu.reciprocal %113 {approx = true} : vector<2x8x1xf32> -> vector<2x8x1xf32>
    %115 = vector.broadcast %114 : vector<2x8x1xf32> to vector<2x8x8xf32>
    %116 = arith.mulf %111, %115 : vector<2x8x8xf32>
    "tpu.trace_start"() <{level = 10 : i32, message = "bqk,bkd->bqd"}> : () -> ()
    %cst_32 = arith.constant dense<0.000000e+00> : vector<2x8x8xf32>
    %117 = tpu.matmul %116, %102, %cst_32 {dimension_numbers = #tpu.dot_dimension_numbers<[2], [1], [1], [2], [0, 0, 0, 1, 1, 2], [0], [0]>} : vector<2x8x8xf32>, vector<2x8x8xf32>, vector<2x8x8xf32> -> vector<2x8x8xf32>
    "tpu.trace_stop"() : () -> ()
    %118 = vector.shape_cast %117 : vector<2x8x8xf32> to vector<16x8xf32>
    %119 = vector.extract_strided_slice %12 {offsets = [24, 0], sizes = [8, 32], strides = [1, 1]} : vector<32x32xf32> to vector<8x32xf32>
    %cst_33 = arith.constant dense<0.000000e+00> : vector<16x32xf32>
    %120 = tpu.matmul %118, %119, %cst_33 {dimension_numbers = #tpu.dot_dimension_numbers<[1], [0], [0], [1], [0, 0, 1, 1], [], []>} : vector<16x8xf32>, vector<8x32xf32>, vector<16x32xf32> -> vector<16x32xf32>
    %121 = arith.addf %94, %120 : vector<16x32xf32>
    %c0_34 = arith.constant 0 : index
    %c0_35 = arith.constant 0 : index
    %122 = vector.load %arg5[%c0_34, %c0_35] : memref<1x32xf32, #tpu.memory_space<vmem>>, vector<1x32xf32>
    %123 = vector.broadcast %122 : vector<1x32xf32> to vector<16x32xf32>
    %124 = arith.addf %121, %123 : vector<16x32xf32>
    %c0_36 = arith.constant 0 : index
    %c0_37 = arith.constant 0 : index
    %125 = vector.load %arg6[%c0_36, %c0_37] : memref<16x32xf32, #tpu.memory_space<vmem>>, vector<16x32xf32>
    tpu.vector_store %arg6[%c0_36, %c0_37], %124 {strides = array<i32>} : memref<16x32xf32, #tpu.memory_space<vmem>>, vector<16x32xf32>,
    return
  }
  func.func @transform_0(%arg0: i32) -> (i32, i32) {
    %c0_i32 = arith.constant 0 : i32
    %c0_i32_0 = arith.constant 0 : i32
    %c0_i32_1 = arith.constant 0 : i32
    return %c0_i32, %c0_i32_0 : i32, i32
  }
  func.func @transform_1(%arg0: i32) -> (i32, i32) {
    %c0_i32 = arith.constant 0 : i32
    %c0_i32_0 = arith.constant 0 : i32
    %c0_i32_1 = arith.constant 0 : i32
    return %c0_i32, %c0_i32_0 : i32, i32
  }
  func.func @transform_2(%arg0: i32) -> (i32, i32) {
    %c0_i32 = arith.constant 0 : i32
    %c0_i32_0 = arith.constant 0 : i32
    %c0_i32_1 = arith.constant 0 : i32
    return %c0_i32, %c0_i32_0 : i32, i32
  }
  func.func @transform_3(%arg0: i32) -> (i32, i32) {
    %c0_i32 = arith.constant 0 : i32
    %c0_i32_0 = arith.constant 0 : i32
    %c0_i32_1 = arith.constant 0 : i32
    return %c0_i32, %c0_i32_0 : i32, i32
  }
  func.func @transform_4(%arg0: i32) -> (i32, i32) {
    %c0_i32 = arith.constant 0 : i32
    %c0_i32_0 = arith.constant 0 : i32
    %c0_i32_1 = arith.constant 0 : i32
    return %c0_i32, %c0_i32_0 : i32, i32
  }
  func.func @transform_5(%arg0: i32) -> (i32, i32) {
    %c0_i32 = arith.constant 0 : i32
    %c0_i32_0 = arith.constant 0 : i32
    %c0_i32_1 = arith.constant 0 : i32
    return %c0_i32, %c0_i32_0 : i32, i32
  }
}

</mosaic_0001>

<bundles_post_ra>
// kernel: tpu_custom_call.1
= control target key start
LH: loop header
LB: loop body
LE: loop exit
PB: predicated region body
PF: predicated region fallthrough
CT: control target
= control target key end

     0   :  { %10 = vsyncpa [#allocation3], 0  ;;  %s2418_s0 = inlined_call_operand.hbm [shape: f32[16,32], index: 0, kind: input, shape index: {}]   ;;  %s2419_s1 = inlined_call_operand.hbm [shape: f32[32,96], index: 1, kind: input, shape index: {}]   ;;  %s2420_s2 = inlined_call_operand.vmem [shape: f32[1,96], index: 2, kind: input, shape index: {}]   ;;  %s2421_s3 = inlined_call_operand.hbm [shape: f32[32,32], index: 3, kind: input, shape index: {}]   ;;  %s2422_s4 = inlined_call_operand.vmem [shape: f32[1,32], index: 4, kind: input, shape index: {}]   ;;  %s2423_s5 = inlined_call_operand.hbm [shape: f32[16,32], index: 5, kind: output, shape index: {}]  }
   0x1   :  { %11 = vsyncpa [#allocation6], 0 }
   0x2   :  { %12 = vsyncpa [#allocation4], 0  ;;  %s2182_s18 = smov [#allocation5]   ;;  %s2183_s20 = smov [#allocation2]  }
   0x3   :  { %s30_s19 = sshll.u32 %s2182_s18, 4  ;;  %s18_s21 = sshll.u32 %s2183_s20, 4  ;;  %s31_s19 = int_to_ptr.vmem [resolvable:$true] %s30_s19  ;;  %s19_s21 = int_to_ptr.vmem [resolvable:$true] %s18_s21 }
   0x4   :  { %s2104_s22 = scalar_lea.vmem %s31_s19, 512  ;;  %p2109_p1 = scmp.lt.s32.totalorder %s31_s19, %s31_s19 }
   0x5   :  { %p2105_p0 = scmp.ne.s32.totalorder %s31_s19, %s2104_s22  ;;  %p2110_p2 = scmp.lt.s32.totalorder %s2104_s22, %s2104_s22 }
   0x7   :  { %p2111_p3 = por %p2110_p2, %p2109_p1 }
   0x9   :  { %p2112_p4 = pnand %p2111_p3, %p2105_p0 }
   0xb   :  { %2115 = shalt.err (!%p2112_p4)
}
   0xc   :  { %s2184_s23 = smov 128   ;;  %s2185_s24 = smov 8  }
   0xd   :  { %36 = dma.hbm_to_vmem [thread:$0]  %s2419_s1, 512, %s31_s19, [#allocation6], %s2184_s23, %s2184_s23, %s2185_s24  }
   0xe   :  { %s2124_s27 = scalar_lea.vmem %s19_s21, 256  ;;  %p2129_p6 = scmp.lt.s32.totalorder %s19_s21, %s19_s21 }
   0xf   :  { %p2125_p5 = scmp.ne.s32.totalorder %s19_s21, %s2124_s27  ;;  %p2130_p7 = scmp.lt.s32.totalorder %s2124_s27, %s2124_s27 }
  0x11   :  { %p2131_p8 = por %p2130_p7, %p2129_p6 }
  0x13   :  { %p2132_p9 = pnand %p2131_p8, %p2125_p5 }
  0x15   :  { %2135 = shalt.err (!%p2132_p9)
}
  0x16   :  { %24 = dma.hbm_to_vmem [thread:$0]  %s2418_s0, 256, %s19_s21, [#allocation3], %s2184_s23, %s2184_s23, %s2185_s24  }
  0x17   :  { %s2186_s30 = smov [#allocation7]  }
  0x18   :  { %s44_s6 = sshll.u32 %s2186_s30, 4  ;;  %s45_s6 = int_to_ptr.vmem [resolvable:$true] %s44_s6 }
  0x19   :  { %s2144_s7 = scalar_lea.vmem %s45_s6, 512  ;;  %p2149_p11 = scmp.lt.s32.totalorder %s45_s6, %s45_s6 }
  0x1a   :  { %p2145_p10 = scmp.ne.s32.totalorder %s45_s6, %s2144_s7  ;;  %p2150_p12 = scmp.lt.s32.totalorder %s2144_s7, %s2144_s7 }
  0x1c   :  { %p2151_p13 = por %p2150_p12, %p2149_p11 }
  0x1e   :  { %p2152_p0 = pnand %p2151_p13, %p2145_p10 }
  0x20   :  { %2155 = shalt.err (!%p2152_p0)
}
  0x21   :  { %50 = dma.hbm_to_vmem [thread:$0]  %s2421_s3, 512, %s45_s6, [#allocation6], %s2184_s23, %s2184_s23, %s2185_s24  }
  0x22   :  { %2176 = dma.done.wait [#allocation3], 256  }
  0x23   :  { %2177 = vsyncadd [#allocation3], 4294967040 }
  0x24   :  { %2178 = dma.done.wait [#allocation6], 1024  }
  0x25   :  { %2179 = vsyncadd [#allocation6], 4294966272  ;;  %vm75_vm0 = vcmask 261120   ;;  %v67_v0 = vld [vmem:[#allocation5 + $0x18] sm:$0xff]  ;;  %v66_v1 = vld [vmem:[#allocation5 + $0x10] sm:$0xff]  ;;  %v2187_v6 = vmov 0.0   ;;  %v157_v16 = vlaneseq }
  0x26   :  { %1933 = vmatprep.subr.mxu0 %v67_v0  ;;  %v62_v2 = vld [vmem:[#allocation2] sm:$0xff]  ;;  %v65_v3 = vld [vmem:[#allocation5 + $0x8] sm:$0xff]  ;;  %v64_v4 = vld [vmem:[#allocation5] sm:$0xff]  ;;  %1944 = vmatprep.subr.mxu1 %v2187_v6  ;;  %vm2188_vm1 = vmmov 0   ;;  %s2189_s9 = smov 96   ;;  %vm172_vm2 = vcmask 64512  }
  0x27   :  { %1934 = vmatpush3.msra.mxu0 %v67_v0  ;;  %1941 = vmatprep.mubr.msk.f32.mxu0 %vm75_vm0, %v62_v2  ;;  %v63_v5 = vld [vmem:[#allocation2 + $0x8] sm:$0xff]  ;;  %v1847_v8 = vld [vmem:[%s2420_s2] ss:$0 sm:$0xff]  ;;  %v158_v17 = vshrl.u32 %v157_v16, 7  ;;  %v160_v18 = vand.u32 127, %v157_v16  ;;  %s2191_s2 = smov 64  }
  0x28   :  { %1935 = vmatprep.subr.mxu0 %v66_v1  ;;  %1946 = vmatprep.mubr.msk.f32.mxu1 %vm2188_vm1, %v2187_v6  ;;  %v2190_v19 = vmov -1e+30   ;;  %s2192_s10 = smov 88   ;;  %s2193_s11 = smov 120  }
  0x29   :  { %1936 = vmatpush3.msra.mxu0 %v66_v1  ;;  %vm161_vm3 = vcmp.le.s32.totalorder %v160_v18, %v158_v17  ;;  %s2194_s12 = smov 56   ;;  %s2195_s13 = smov 112  }
  0x2a   :  { %1937 = vmatprep.subr.mxu0 %v65_v3  ;;  %v2285_v20 = vsel %vm161_vm3, 0.0, %v2190_v19  ;;  %s2196_s14 = smov 80   ;;  %s2197_s15 = smov 48  }
  0x2b   :  { %1938 = vmatpush3.msra.mxu0 %v65_v3  ;;  %s2198_s16 = smov 72   ;;  %s2199_s17 = smov 104  }
  0x2c   :  { %1939 = vmatprep.subr.mxu0 %v64_v4  ;;  %s2200_s18 = smov 40   ;;  %s2201_s21 = smov [#allocation8]  }
  0x2d   :  { %1940 = vmatpush3.msra.mxu0 %v64_v4  ;;  %s1834_s22 = sshll.u32 %s2201_s21, 4  ;;  %s1835_s22 = int_to_ptr.vmem [resolvable:$true] %s1834_s22 }
  0x2e   :  { %1942 = vmatmul.mubr.msk.f32.vlgmr.msra.gmra.mxu0 %vm75_vm0, %v63_v5  ;;  %1954 = vmatprep.subr.mxu0 %v2187_v6  ;;  %s2156_s25 = scalar_lea.vmem %s1835_s22, 256  ;;  %p2161_p2 = scmp.lt.s32.totalorder %s1835_s22, %s1835_s22 }
  0x2f   :  { %1956 = vmatprep.mubr.msk.f32.mxu0 %vm2188_vm1, %v2187_v6  ;;  %p2157_p1 = scmp.ne.s32.totalorder %s1835_s22, %s2156_s25  ;;  %p2162_p3 = scmp.lt.s32.totalorder %s2156_s25, %s2156_s25 }
  0x31   :  { %p2163_p4 = por %p2162_p3, %p2161_p2 }
  0x33   :  { %p2164_p5 = pnand %p2163_p4, %p2157_p1 }
  0xee   :  { %v1943_v7 = vpop.f32.mrf.mxu0 }
  0xef   :  { %v2264_v11 = vadd.f32 %v1943_v7, %v1847_v8 }
  0xf0   :  { %v148_v9 = vpop.f32.mrf.mxu0 }
  0xf1   :  { %v2261_v10 = vadd.f32 %v1847_v8, %v148_v9  ;;  %v2278_v15 = vmul.f32 0.35355338, %v2264_v11 }
  0xf3   :  { %170 = vrot.lane.b32.xlu0 %v2261_v10, %s2189_s9  ;;  %v2270_v13 = vmul.f32 0.35355338, %v2261_v10 }
  0xf7   :  { %249 = vrot.lane.b32.xlu0 %v2264_v11, %s2189_s9 }
 0x165   :  { %v171_v12 = vpop.permute.xlu0 %170 }
 0x166   :  { %1945 = vmatpush3.xpose.msk.msra.mxu1 %vm172_vm2, %v171_v12 }
 0x167   :  { %1949 = vmatprep.subr.mxu1 %v2187_v6 }
 0x169   :  { %v250_v14 = vpop.permute.xlu0 %249  ;;  %1947 = vmatmul.mubr.msk.f32.vlgmr.msra.gmra.mxu1 %vm172_vm2, %v2270_v13 }
 0x16a   :  { %1950 = vmatpush3.xpose.msk.msra.mxu1 %vm172_vm2, %v250_v14  ;;  %1951 = vmatprep.mubr.msk.f32.mxu1 %vm2188_vm1, %v2187_v6  ;;  %v163_v14 = vld [vmem:[#allocation7] sm:$0xff] }
 0x16b   :  { %1959 = vmatprep.subr.mxu1 %v2187_v6 }
 0x16d   :  { %1952 = vmatmul.mubr.msk.f32.vlgmr.msra.gmra.mxu1 %vm172_vm2, %v2278_v15 }
 0x16e   :  { %1961 = vmatprep.mubr.msk.f32.mxu1 %vm2188_vm1, %v2187_v6 }
 0x229   :  { %v244_v21 = vpop.f32.mrf.mxu1 }
 0x22a   :  { %v245_v22 = vadd.f32 %v244_v21, %v2285_v20 }
 0x22b   :  { %v1948_v23 = vpop.f32.mrf.mxu1 }
 0x22c   :  { %v326_v24 = vsel %vm172_vm2, %v245_v22, -inf }
 0x22d   :  { %327 = vmax.xlane.f32.xlu1 %v326_v24  ;;  %v322_v25 = vpop.f32.mrf.mxu1 }
 0x22e   :  { %v323_v26 = vadd.f32 %v322_v25, %v2285_v20 }
 0x22f   :  { %v1953_v27 = vpop.f32.mrf.mxu1 }
 0x230   :  { %v329_v28 = vsel %vm172_vm2, %v323_v26, -inf  ;;  %v164_v27 = vld [vmem:[#allocation7 + $0x8] sm:$0xff] }
 0x231   :  { %330 = vmax.xlane.f32.xlu1 %v329_v28 }
 0x242   :  { %348 = vrot.lane.b32.xlu1 %v2261_v10, %s2191_s2 }
 0x246   :  { %424 = vrot.lane.b32.xlu1 %v2264_v11, %s2191_s2 }
 0x24a   :  { %502 = vrot.lane.b32.xlu1 %v2261_v10, %s2192_s10 }
 0x24e   :  { %580 = vrot.lane.b32.xlu1 %v2264_v11, %s2192_s10 }
 0x2b6   :  { %v328_v29 = vpop.xlane.xlu1 %327 }
 0x2b7   :  { %v332_v30 = vsub.f32 %v245_v22, %v328_v29 }
 0x2b9   :  { %v334_v31 = vmul.f32 1.442695, %v332_v30 }
 0x2ba   :  { %v331_v32 = vpop.xlane.xlu1 %330 }
 0x2bb   :  { %2064 = vpow2.f32 %v334_v31  ;;  %v333_v33 = vsub.f32 %v323_v26, %v331_v32 }
 0x2bd   :  { %v336_v34 = vmul.f32 1.442695, %v333_v33 }
 0x2be   :  { %v349_v35 = vpop.permute.xlu1 %348 }
 0x2bf   :  { %2066 = vpow2.f32 %v336_v34  ;;  %1955 = vmatpush3.msra.mxu0 %v349_v35 }
 0x2c0   :  { %1964 = vmatprep.subr.mxu0 %v2187_v6 }
 0x2c2   :  { %v425_v36 = vpop.permute.xlu1 %424 }
 0x2c3   :  { %1960 = vmatpush3.msra.mxu1 %v425_v36 }
 0x2c4   :  { %1969 = vmatprep.subr.mxu1 %v2187_v6 }
 0x2c6   :  { %v503_v41 = vpop.permute.xlu1 %502 }
 0x2c8   :  { %v2065_v37 = vpop.eup %2064 }
 0x2c9   :  { %v338_v38 = vsel %vm172_vm2, %v2065_v37, 0.0 }
 0x2ca   :  { %339 = vadd.xlane.f32.xlu0 %v338_v38  ;;  %v581_v42 = vpop.permute.xlu1 %580 }
 0x2cc   :  { %v2067_v39 = vpop.eup %2066 }
 0x2cd   :  { %v341_v40 = vsel %vm172_vm2, %v2067_v39, 0.0 }
 0x2ce   :  { %342 = vadd.xlane.f32.xlu1 %v341_v40 }
 0x2df   :  { %578 = vrot.lane.b32.xlu1 %v2278_v15, %s2193_s11 }
 0x2e0   :  { %500 = vrot.lane.b32.xlu0 %v2270_v13, %s2193_s11 }
 0x353   :  { %v340_v43 = vpop.xlane.xlu0 %339 }
 0x354   :  { %2068 = vrcp.f32 %v340_v43 }
 0x357   :  { %v343_v44 = vpop.xlane.xlu1 %342  ;;  %v501_v49 = vpop.permute.xlu0 %500 }
 0x358   :  { %2070 = vrcp.f32 %v343_v44 }
 0x35b   :  { %v579_v50 = vpop.permute.xlu1 %578 }
 0x361   :  { %v2069_v45 = vpop.eup %2068 }
 0x362   :  { %v346_v46 = vmul.f32 %v2069_v45, %v2065_v37 }
 0x364   :  { %1957 = vmatmul.mubr.msk.f32.vlgmr.msra.gmra.mxu0 %vm172_vm2, %v346_v46 }
 0x365   :  { %v2071_v47 = vpop.eup %2070  ;;  %1965 = vmatpush3.xpose.msk.msra.mxu0 %vm172_vm2, %v503_v41  ;;  %1966 = vmatprep.mubr.msk.f32.mxu0 %vm2188_vm1, %v2187_v6 }
 0x366   :  { %v347_v48 = vmul.f32 %v2071_v47, %v2067_v39  ;;  %1974 = vmatprep.subr.mxu0 %v2187_v6 }
 0x368   :  { %1962 = vmatmul.mubr.msk.f32.vlgmr.msra.gmra.mxu1 %vm172_vm2, %v347_v48  ;;  %1967 = vmatmul.mubr.msk.f32.vlgmr.msra.gmra.mxu0 %vm172_vm2, %v501_v49 }
 0x369   :  { %1970 = vmatpush3.xpose.msk.msra.mxu1 %vm172_vm2, %v581_v42  ;;  %1971 = vmatprep.mubr.msk.f32.mxu1 %vm2188_vm1, %v2187_v6 }
 0x36a   :  { %1979 = vmatprep.subr.mxu1 %v2187_v6  ;;  %1976 = vmatprep.mubr.msk.f32.mxu0 %vm2188_vm1, %v2187_v6 }
 0x36c   :  { %1972 = vmatmul.mubr.msk.f32.vlgmr.msra.gmra.mxu1 %vm172_vm2, %v579_v50 }
 0x36d   :  { %1981 = vmatprep.mubr.msk.f32.mxu1 %vm2188_vm1, %v2187_v6 }
 0x424   :  { %v420_v51 = vpop.f32.mrf.mxu0 }
 0x426   :  { %v1958_v52 = vpop.f32.mrf.mxu0 }
 0x428   :  { %v496_v53 = vpop.f32.mrf.mxu1  ;;  %v574_v54 = vpop.f32.mrf.mxu0 }
 0x429   :  { %v575_v55 = vadd.f32 %v574_v54, %v2285_v20 }
 0x42a   :  { %v1963_v56 = vpop.f32.mrf.mxu1  ;;  %v1968_v57 = vpop.f32.mrf.mxu0 }
 0x42b   :  { %v656_v58 = vsel %vm172_vm2, %v575_v55, -inf }
 0x42c   :  { %657 = vmax.xlane.f32.xlu1 %v656_v58  ;;  %v652_v59 = vpop.f32.mrf.mxu1 }
 0x42d   :  { %v653_v60 = vadd.f32 %v652_v59, %v2285_v20 }
 0x42e   :  { %v1973_v61 = vpop.f32.mrf.mxu1 }
 0x42f   :  { %v659_v62 = vsel %vm172_vm2, %v653_v60, -inf }
 0x430   :  { %660 = vmax.xlane.f32.xlu0 %v659_v62 }
 0x446   :  { %754 = vrot.lane.b32.xlu0 %v2264_v11, %s2194_s12 }
 0x44a   :  { %992 = vrot.lane.b32.xlu0 %v2270_v13, %s2195_s13 }
 0x4b5   :  { %v658_v63 = vpop.xlane.xlu1 %657 }
 0x4b6   :  { %v662_v0 = vsub.f32 %v575_v55, %v658_v63  ;;  %v165_v63 = vld [vmem:[#allocation7 + $0x10] sm:$0xff] }
 0x4b8   :  { %v664_v1 = vmul.f32 1.442695, %v662_v0 }
 0x4b9   :  { %v661_v2 = vpop.xlane.xlu0 %660 }
 0x4ba   :  { %2072 = vpow2.f32 %v664_v1  ;;  %v663_v3 = vsub.f32 %v653_v60, %v661_v2 }
 0x4bc   :  { %v666_v4 = vmul.f32 1.442695, %v663_v3 }
 0x4bd   :  { %v755_v5 = vpop.permute.xlu0 %754 }
 0x4be   :  { %2074 = vpow2.f32 %v666_v4  ;;  %1980 = vmatpush3.msra.mxu1 %v755_v5 }
 0x4bf   :  { %1989 = vmatprep.subr.mxu1 %v163_v14 }
 0x4c1   :  { %v993_v32 = vpop.permute.xlu0 %992 }
 0x4c7   :  { %v2073_v7 = vpop.eup %2072 }
 0x4c8   :  { %v668_v8 = vsel %vm172_vm2, %v2073_v7, 0.0 }
 0x4c9   :  { %669 = vadd.xlane.f32.xlu1 %v668_v8 }
 0x4cb   :  { %v2075_v9 = vpop.eup %2074 }
 0x4cc   :  { %v671_v12 = vsel %vm172_vm2, %v2075_v9, 0.0 }
 0x4cd   :  { %672 = vadd.xlane.f32.xlu1 %v671_v12 }
 0x4de   :  { %678 = vrot.lane.b32.xlu1 %v2261_v10, %s2194_s12 }
 0x4e2   :  { %994 = vrot.lane.b32.xlu1 %v2261_v10, %s2196_s14 }
 0x4e6   :  { %1072 = vrot.lane.b32.xlu1 %v2264_v11, %s2196_s14 }
 0x4ea   :  { %1070 = vrot.lane.b32.xlu1 %v2278_v15, %s2195_s13 }
 0x552   :  { %v670_v16 = vpop.xlane.xlu1 %669 }
 0x553   :  { %2076 = vrcp.f32 %v670_v16 }
 0x556   :  { %v673_v17 = vpop.xlane.xlu1 %672 }
 0x557   :  { %2078 = vrcp.f32 %v673_v17 }
 0x55a   :  { %v679_v18 = vpop.permute.xlu1 %678 }
 0x55b   :  { %1975 = vmatpush3.msra.mxu0 %v679_v18 }
 0x55c   :  { %1984 = vmatprep.subr.mxu0 %v164_v27 }
 0x55e   :  { %v995_v22 = vpop.permute.xlu1 %994 }
 0x560   :  { %v2077_v19 = vpop.eup %2076 }
 0x561   :  { %v676_v21 = vmul.f32 %v2077_v19, %v2073_v7 }
 0x562   :  { %v1073_v25 = vpop.permute.xlu1 %1072 }
 0x563   :  { %1977 = vmatmul.mubr.msk.f32.vlgmr.msra.gmra.mxu0 %vm172_vm2, %v676_v21 }
 0x564   :  { %v2079_v23 = vpop.eup %2078  ;;  %1985 = vmatpush3.msra.mxu0 %v164_v27 }
 0x565   :  { %v677_v24 = vmul.f32 %v2079_v23, %v2075_v9  ;;  %1994 = vmatprep.subr.mxu0 %v2187_v6 }
 0x566   :  { %v1071_v26 = vpop.permute.xlu1 %1070 }
 0x567   :  { %1982 = vmatmul.mubr.msk.f32.vlgmr.msra.gmra.mxu1 %vm172_vm2, %v677_v24 }
 0x568   :  { %1991 = vmatprep.mubr.msk.f32.mxu1 %vm172_vm2, %v420_v51  ;;  %1990 = vmatpush3.msra.mxu1 %v163_v14 }
 0x569   :  { %1999 = vmatprep.subr.mxu1 %v2187_v6 }
 0x56b   :  { %1992 = vmatmul.mubr.msk.f32.vlgmr.msra.gmra.mxu1 %vm172_vm2, %v496_v53 }
 0x56c   :  { %2000 = vmatpush3.xpose.msk.msra.mxu1 %vm172_vm2, %v1073_v25  ;;  %2001 = vmatprep.mubr.msk.f32.mxu1 %vm2188_vm1, %v2187_v6 }
 0x56d   :  { %2009 = vmatprep.subr.mxu1 %v2187_v6 }
 0x56f   :  { %2002 = vmatmul.mubr.msk.f32.vlgmr.msra.gmra.mxu1 %vm172_vm2, %v1071_v26 }
 0x570   :  { %2011 = vmatprep.mubr.msk.f32.mxu1 %vm2188_vm1, %v2187_v6 }
 0x623   :  { %v750_v28 = vpop.f32.mrf.mxu0 }
 0x624   :  { %1986 = vmatprep.mubr.msk.f32.mxu0 %vm172_vm2, %v750_v28 }
 0x625   :  { %v1978_v29 = vpop.f32.mrf.mxu0 }
 0x627   :  { %v826_v30 = vpop.f32.mrf.mxu1 }
 0x628   :  { %1987 = vmatmul.mubr.msk.f32.vlgmr.msra.gmra.mxu0 %vm172_vm2, %v826_v30 }
 0x629   :  { %1995 = vmatpush3.xpose.msk.msra.mxu0 %vm172_vm2, %v995_v22  ;;  %v1983_v31 = vpop.f32.mrf.mxu1  ;;  %1996 = vmatprep.mubr.msk.f32.mxu0 %vm2188_vm1, %v2187_v6 }
 0x62a   :  { %2004 = vmatprep.subr.mxu0 %v2187_v6 }
 0x62b   :  { %v2348_v33 = vpop.f32.mrf.mxu1 }
 0x62c   :  { %1997 = vmatmul.mubr.msk.f32.vlgmr.msra.gmra.mxu0 %vm172_vm2, %v993_v32 }
 0x62d   :  { %v2351_v34 = vpop.f32.mrf.mxu1  ;;  %2006 = vmatprep.mubr.msk.f32.mxu0 %vm2188_vm1, %v2187_v6 }
 0x62f   :  { %v1144_v35 = vpop.f32.mrf.mxu1 }
 0x630   :  { %v1145_v36 = vadd.f32 %v1144_v35, %v2285_v20 }
 0x631   :  { %v2003_v37 = vpop.f32.mrf.mxu1 }
 0x632   :  { %v1151_v38 = vsel %vm172_vm2, %v1145_v36, -inf }
 0x633   :  { %1152 = vmax.xlane.f32.xlu1 %v1151_v38  ;;  %v166_v38 = vld [vmem:[#allocation7 + $0x18] sm:$0xff] }
 0x644   :  { %1170 = vrot.lane.b32.xlu1 %v2261_v10, %s2197_s15 }
 0x648   :  { %1407 = vrot.lane.b32.xlu1 %v2261_v10, %s2198_s16 }
 0x64c   :  { %1485 = vrot.lane.b32.xlu1 %v2264_v11, %s2198_s16 }
 0x650   :  { %1483 = vrot.lane.b32.xlu1 %v2278_v15, %s2199_s17 }
 0x6bc   :  { %v1153_v39 = vpop.xlane.xlu1 %1152 }
 0x6bd   :  { %v1155_v41 = vsub.f32 %v1145_v36, %v1153_v39 }
 0x6bf   :  { %v1158_v42 = vmul.f32 1.442695, %v1155_v41 }
 0x6c0   :  { %v1171_v40 = vpop.permute.xlu1 %1170 }
 0x6c1   :  { %2005 = vmatpush3.msra.mxu0 %v1171_v40  ;;  %2080 = vpow2.f32 %v1158_v42 }
 0x6c2   :  { %2014 = vmatprep.subr.mxu0 %v165_v63 }
 0x6c4   :  { %v1408_v60 = vpop.permute.xlu1 %1407 }
 0x6c8   :  { %v1486_v7 = vpop.permute.xlu1 %1485 }
 0x6cc   :  { %v1484_v12 = vpop.permute.xlu1 %1483 }
 0x6ce   :  { %v2081_v49 = vpop.eup %2080 }
 0x6cf   :  { %v1163_v15 = vsel %vm172_vm2, %v2081_v49, 0.0 }
 0x6e8   :  { %v2361_v43 = vpop.f32.mrf.mxu0 }
 0x6e9   :  { %v989_v21 = vadd.f32 %v2348_v33, %v2361_v43 }
 0x6ea   :  { %v2363_v44 = vpop.f32.mrf.mxu0 }
 0x6eb   :  { %v984_v23 = vadd.f32 %v2351_v34, %v2363_v44 }
 0x6ec   :  { %v1066_v45 = vpop.f32.mrf.mxu0 }
 0x6ed   :  { %v1067_v46 = vadd.f32 %v1066_v45, %v2285_v20 }
 0x6ee   :  { %v1998_v47 = vpop.f32.mrf.mxu0 }
 0x6ef   :  { %v1148_v48 = vsel %vm172_vm2, %v1067_v46, -inf }
 0x6f0   :  { %1149 = vmax.xlane.f32.xlu0 %v1148_v48 }
 0x6f4   :  { %1164 = vadd.xlane.f32.xlu0 %v1163_v15 }
 0x779   :  { %v1150_v50 = vpop.xlane.xlu0 %1149 }
 0x77a   :  { %v1154_v51 = vsub.f32 %v1067_v46, %v1150_v50  ;;  %v1882_v46 = vld [vmem:[%s2422_s4] ss:$0 sm:$0xff] }
 0x77c   :  { %v1156_v52 = vmul.f32 1.442695, %v1154_v51 }
 0x77d   :  { %v1165_v55 = vpop.xlane.xlu0 %1164 }
 0x77e   :  { %2082 = vpow2.f32 %v1156_v52 }
 0x77f   :  { %2084 = vrcp.f32 %v1165_v55 }
 0x78b   :  { %v2083_v53 = vpop.eup %2082 }
 0x78c   :  { %v1160_v54 = vsel %vm172_vm2, %v2083_v53, 0.0  ;;  %v2085_v57 = vpop.eup %2084 }
 0x78d   :  { %1161 = vadd.xlane.f32.xlu0 %v1160_v54  ;;  %v1169_v59 = vmul.f32 %v2085_v57, %v2081_v49 }
 0x7a3   :  { %1246 = vrot.lane.b32.xlu0 %v2264_v11, %s2197_s15 }
 0x7a7   :  { %1405 = vrot.lane.b32.xlu0 %v2270_v13, %s2199_s17 }
 0x816   :  { %v1162_v56 = vpop.xlane.xlu0 %1161 }
 0x817   :  { %2086 = vrcp.f32 %v1162_v56 }
 0x81a   :  { %v1247_v58 = vpop.permute.xlu0 %1246 }
 0x81b   :  { %2010 = vmatpush3.msra.mxu1 %v1247_v58 }
 0x81c   :  { %2012 = vmatmul.mubr.msk.f32.vlgmr.msra.gmra.mxu1 %vm172_vm2, %v1169_v59  ;;  %2019 = vmatprep.subr.mxu1 %v2187_v6 }
 0x81d   :  { %2020 = vmatpush3.xpose.msk.msra.mxu1 %vm172_vm2, %v1408_v60  ;;  %2021 = vmatprep.mubr.msk.f32.mxu1 %vm2188_vm1, %v2187_v6 }
 0x81e   :  { %v1406_v61 = vpop.permute.xlu0 %1405  ;;  %2029 = vmatprep.subr.mxu1 %v2187_v6 }
 0x820   :  { %2022 = vmatmul.mubr.msk.f32.vlgmr.msra.gmra.mxu1 %vm172_vm2, %v1406_v61 }
 0x821   :  { %2031 = vmatprep.mubr.msk.f32.mxu1 %vm2188_vm1, %v2187_v6 }
 0x824   :  { %v2087_v13 = vpop.eup %2086 }
 0x825   :  { %v1168_v62 = vmul.f32 %v2087_v13, %v2083_v53 }
 0x827   :  { %2007 = vmatmul.mubr.msk.f32.vlgmr.msra.gmra.mxu0 %vm172_vm2, %v1168_v62 }
 0x828   :  { %2015 = vmatpush3.msra.mxu0 %v165_v63 }
 0x829   :  { %2024 = vmatprep.subr.mxu0 %v2187_v6 }
 0x8dc   :  { %v1318_v0 = vpop.f32.mrf.mxu1 }
 0x8de   :  { %v2013_v1 = vpop.f32.mrf.mxu1 }
 0x8e0   :  { %v1479_v2 = vpop.f32.mrf.mxu1 }
 0x8e1   :  { %v1480_v3 = vadd.f32 %v1479_v2, %v2285_v20 }
 0x8e2   :  { %v2023_v4 = vpop.f32.mrf.mxu1 }
 0x8e3   :  { %v1561_v5 = vsel %vm172_vm2, %v1480_v3, -inf }
 0x8e4   :  { %1562 = vmax.xlane.f32.xlu0 %v1561_v5 }
 0x8e7   :  { %v1242_v8 = vpop.f32.mrf.mxu0 }
 0x8e8   :  { %2016 = vmatprep.mubr.msk.f32.mxu0 %vm172_vm2, %v1242_v8 }
 0x8e9   :  { %v2008_v9 = vpop.f32.mrf.mxu0  ;;  %2017 = vmatmul.mubr.msk.f32.vlgmr.msra.gmra.mxu0 %vm172_vm2, %v1318_v0 }
 0x8ea   :  { %2025 = vmatpush3.xpose.msk.msra.mxu0 %vm172_vm2, %v1486_v7  ;;  %2026 = vmatprep.mubr.msk.f32.mxu0 %vm2188_vm1, %v2187_v6 }
 0x8eb   :  { %2034 = vmatprep.subr.mxu0 %v2187_v6 }
 0x8ed   :  { %2027 = vmatmul.mubr.msk.f32.vlgmr.msra.gmra.mxu0 %vm172_vm2, %v1484_v12 }
 0x8ee   :  { %2036 = vmatprep.mubr.msk.f32.mxu0 %vm2188_vm1, %v2187_v6 }
 0x96d   :  { %v1563_v14 = vpop.xlane.xlu0 %1562 }
 0x96e   :  { %v1567_v16 = vsub.f32 %v1480_v3, %v1563_v14 }
 0x970   :  { %v1569_v17 = vmul.f32 1.442695, %v1567_v16 }
 0x972   :  { %2088 = vpow2.f32 %v1569_v17 }
 0x97f   :  { %v2089_v18 = vpop.eup %2088 }
 0x980   :  { %v1573_v19 = vsel %vm172_vm2, %v2089_v18, 0.0 }
 0x981   :  { %1574 = vadd.xlane.f32.xlu0 %v1573_v19 }
 0x9a9   :  { %v2018_v22 = vpop.f32.mrf.mxu0 }
 0x9aa   :  { %v1404_v24 = vadd.f32 %v2018_v22, %v989_v21 }
 0x9ab   :  { %v1394_v25 = vpop.f32.mrf.mxu0 }
 0x9ac   :  { %v1403_v26 = vadd.f32 %v1394_v25, %v984_v23 }
 0x9ad   :  { %v1557_v27 = vpop.f32.mrf.mxu0 }
 0x9ae   :  { %v1558_v6 = vadd.f32 %v1557_v27, %v2285_v20 }
 0x9af   :  { %v2028_v28 = vpop.f32.mrf.mxu0 }
 0x9b0   :  { %v1564_v29 = vsel %vm172_vm2, %v1558_v6, -inf }
 0x9b1   :  { %1565 = vmax.xlane.f32.xlu1 %v1564_v29 }
 0x9c2   :  { %1583 = vrot.lane.b32.xlu1 %v2261_v10, %s2200_s18 }
 0xa0a   :  { %v1575_v30 = vpop.xlane.xlu0 %1574 }
 0xa0b   :  { %2090 = vrcp.f32 %v1575_v30 }
 0xa18   :  { %v2091_v32 = vpop.eup %2090 }
 0xa19   :  { %v1581_v36 = vmul.f32 %v2091_v32, %v2089_v18 }
 0xa3a   :  { %v1566_v31 = vpop.xlane.xlu1 %1565 }
 0xa3b   :  { %v1568_v33 = vsub.f32 %v1558_v6, %v1566_v31 }
 0xa3d   :  { %v1571_v35 = vmul.f32 1.442695, %v1568_v33 }
 0xa3e   :  { %v1584_v34 = vpop.permute.xlu1 %1583 }
 0xa3f   :  { %2092 = vpow2.f32 %v1571_v35  ;;  %2030 = vmatpush3.msra.mxu1 %v1584_v34 }
 0xa40   :  { %2032 = vmatmul.mubr.msk.f32.vlgmr.msra.gmra.mxu1 %vm172_vm2, %v1581_v36  ;;  %2039 = vmatprep.subr.mxu1 %v166_v38 }
 0xa41   :  { %2040 = vmatpush3.msra.mxu1 %v166_v38 }
 0xa4c   :  { %v2093_v20 = vpop.eup %2092 }
 0xa4d   :  { %v1576_v37 = vsel %vm172_vm2, %v2093_v20, 0.0 }
 0xa4e   :  { %1577 = vadd.xlane.f32.xlu0 %v1576_v37 }
 0xa64   :  { %1659 = vrot.lane.b32.xlu0 %v2264_v11, %s2200_s18 }
 0xad7   :  { %v1578_v10 = vpop.xlane.xlu0 %1577 }
 0xad8   :  { %2094 = vrcp.f32 %v1578_v10 }
 0xadb   :  { %v1660_v39 = vpop.permute.xlu0 %1659 }
 0xadc   :  { %2035 = vmatpush3.msra.mxu0 %v1660_v39 }
 0xae5   :  { %v2095_v40 = vpop.eup %2094 }
 0xae6   :  { %v1582_v41 = vmul.f32 %v2095_v40, %v2093_v20 }
 0xae8   :  { %2037 = vmatmul.mubr.msk.f32.vlgmr.msra.gmra.mxu0 %vm172_vm2, %v1582_v41 }
 0xb00   :  { %v1655_v42 = vpop.f32.mrf.mxu1 }
 0xb01   :  { %2041 = vmatprep.mubr.msk.f32.mxu1 %vm172_vm2, %v1655_v42 }
 0xb02   :  { %v2033_v43 = vpop.f32.mrf.mxu1 }
 0xba8   :  { %v1731_v44 = vpop.f32.mrf.mxu0 }
 0xba9   :  { %2042 = vmatmul.mubr.msk.f32.vlgmr.msra.gmra.mxu1 %vm172_vm2, %v1731_v44 }
 0xbaa   :  { %v2038_v45 = vpop.f32.mrf.mxu0 }
 0xc69   :  { %v2043_v11 = vpop.f32.mrf.mxu1 }
 0xc6a   :  { %v1817_v47 = vadd.f32 %v2043_v11, %v1404_v24 }
 0xc6b   :  { %v1807_v48 = vpop.f32.mrf.mxu1 }
 0xc6c   :  { %v1826_v49 = vadd.f32 %v1882_v46, %v1817_v47  ;;  %v1816_v15 = vadd.f32 %v1807_v48, %v1403_v26 }
 0xc6e   :  { %1828 = vst.msk [vmem:[#allocation8 + $0x8] sm:$0xff] %vm75_vm0, %v1826_v49  ;;  %v1825_v50 = vadd.f32 %v1882_v46, %v1816_v15 }
 0xc70   :  { %1827 = vst.msk [vmem:[#allocation8] sm:$0xff] %vm75_vm0, %v1825_v50 }
 0xc71   :  { %2167 = shalt.err (!%p2164_p5)
}
 0xc72   :  { %1840 = dma.vmem_to_hbm [thread:$0]  %s1835_s22, 256, %s2423_s5, [#allocation4], %s2184_s23, %s2184_s23, %s2185_s24  }
 0xc73   :  { %2180 = dma.done.wait [#allocation4], 256  }
 0xc74   :  { %2181 = vsyncadd [#allocation4], 4294967040 }
 0xc75   :  { %1844 = vsyncpa [#allocation3], 1 }
 0xc76   :  { %1845 = vsyncpa [#allocation6], 1 }
 0xc77   :  { %1846 = vsyncpa [#allocation4], 1 }

</bundles_post_ra>
